<compile_context>
chip_gen: v6e
topology: v6e:2x2x1
jax: 0.10.0
libtpu: 0.0.40
codegen_flags: <defaults>
</compile_context>

<pallas_src>
import functools

import jax
import jax.numpy as jnp
from jax.experimental import pallas as pl
from jax.experimental.pallas import tpu as pltpu

_LANE = 128
_SUBLANE = 8
_MXU_WIDE = 256  # v6e / v7x MXU native width


def _round_up(n, m):
    return ((n + m - 1) // m) * m


def _pad_last2(a, rows, cols):
    pads = [(0, 0)] * (a.ndim - 2)
    pads += [(0, rows - a.shape[-2]), (0, cols - a.shape[-1])]
    return jnp.pad(a, pads)


def _vmem_budget_bytes():
    """Scoped-VMEM budget derived from the chip, with headroom."""
    try:
        cap = int(pltpu.get_tpu_info().vmem_capacity_bytes)
    except Exception:
        cap = 64 * 1024 * 1024  # v7x per-TensorCore VMEM; safe everywhere
    # ~100 MB ceiling on 128 MiB parts (v5e/v6e), ~51 MB on v7x.
    return min(int(cap * 0.8), 100 * 1024 * 1024)


# ---------------------------------------------------------------------------
# Kernels
# ---------------------------------------------------------------------------

def _fused_kernel(num_blocks, n_hidden, has_hidden, wdtype, *refs):
    """Fast path: all block weights resident in VMEM, blocks looped in-kernel.

    grid = (batch_tiles,).  Weight index maps are constant across the grid so
    Pallas fetches them once and keeps them resident across batch tiles."""
    if has_hidden:
        xtc_ref, w1_ref, b1_ref, wh_ref, bh_ref, wo_ref, bo_ref, o_ref = refs
    else:
        xtc_ref, w1_ref, b1_ref, wo_ref, bo_ref, o_ref = refs
        wh_ref = bh_ref = None

    state = xtc_ref[...]                                   # (Bt, K_pad) f32
    for blk in range(num_blocks):
        h = jnp.dot(state.astype(wdtype), w1_ref[blk],
                    preferred_element_type=jnp.float32) + b1_ref[blk]
        h = jnp.maximum(h, 0.0)
        for layer in range(n_hidden):
            h = jnp.dot(h.astype(wdtype), wh_ref[blk, layer],
                        preferred_element_type=jnp.float32) + bh_ref[blk, layer]
            h = jnp.maximum(h, 0.0)
        # Wo/bo are zero outside the first input_dim columns -> only the
        # x-columns of the state slab change (== residual connection).
        state = state + jnp.dot(h.astype(wdtype), wo_ref[blk],
                                preferred_element_type=jnp.float32) + bo_ref[blk]
    o_ref[...] = state


def _streamed_kernel(n_hidden, has_hidden, wdtype, *refs):
    """Streaming path: one residual block per step of grid axis 1 (block axis).

    The output tile is the resident residual accumulator across the
    'arbitrary' block axis; HBM write-back happens after the last block."""
    if has_hidden:
        xtc_ref, w1_ref, b1_ref, wh_ref, bh_ref, wo_ref, bo_ref, o_ref = refs
    else:
        xtc_ref, w1_ref, b1_ref, wo_ref, bo_ref, o_ref = refs
        wh_ref = bh_ref = None

    blk = pl.program_id(1)

    @pl.when(blk == 0)
    def _():
        o_ref[...] = xtc_ref[...]

    state = o_ref[...]
    h = jnp.dot(state.astype(wdtype), w1_ref[0],
                preferred_element_type=jnp.float32) + b1_ref[0]
    h = jnp.maximum(h, 0.0)
    for layer in range(n_hidden):
        h = jnp.dot(h.astype(wdtype), wh_ref[0, layer],
                    preferred_element_type=jnp.float32) + bh_ref[0, layer]
        h = jnp.maximum(h, 0.0)
    o_ref[...] = state + jnp.dot(h.astype(wdtype), wo_ref[0],
                                 preferred_element_type=jnp.float32) + bo_ref[0]


# ---------------------------------------------------------------------------
# Host-side wrappers
# ---------------------------------------------------------------------------

def prepare_params(params, *, weight_dtype=jnp.bfloat16):
    """One-time weight preparation. Call ONCE, outside the sampling loop.

    Zero-pads every matrix to MXU-friendly multiples (padding keeps the math
    exact) and casts the matmul weights to `weight_dtype` (bf16 recommended).
    Biases stay f32 (added after the f32 accumulation)."""
    w1, b1, wh, bh, wo, bo = params
    _, K, H = w1.shape
    k_mult = _MXU_WIDE if K >= _MXU_WIDE else _LANE
    h_mult = _MXU_WIDE if H >= _MXU_WIDE else _LANE
    K_pad = _round_up(K, k_mult)
    H_pad = _round_up(H, h_mult)

    w1p = _pad_last2(w1, K_pad, H_pad).astype(weight_dtype)
    b1p = _pad_last2(b1, 1, H_pad).astype(jnp.float32)
    wop = _pad_last2(wo, H_pad, K_pad).astype(weight_dtype)
    bop = _pad_last2(bo, 1, K_pad).astype(jnp.float32)
    if wh is not None and wh.shape[1] > 0:
        whp = _pad_last2(wh, H_pad, H_pad).astype(weight_dtype)
        bhp = _pad_last2(bh, 1, H_pad).astype(jnp.float32)
    else:
        whp, bhp = None, None
    return (w1p, b1p, whp, bhp, wop, bop)


@functools.partial(jax.jit, static_argnames=("force_streaming",))
def resnet_forward(x, t, context, prepared, force_streaming=False):
    """ResNet forward. `prepared` must come from prepare_params() (one-time)."""
    w1p, b1p, whp, bhp, wop, bop = prepared
    B, D = x.shape
    C = context.shape[-1]
    K = D + 1 + C
    num_blocks, K_pad, H_pad = w1p.shape
    if K > K_pad:
        raise ValueError("prepared params do not match input/context dims")
    n_hidden = whp.shape[1] if whp is not None else 0
    has_hidden = n_hidden > 0
    wdtype = w1p.dtype
    wbytes = jnp.dtype(wdtype).itemsize

    vmem_limit = _vmem_budget_bytes()

    per_block_w = ((K_pad * H_pad + n_hidden * H_pad * H_pad + H_pad * K_pad) * wbytes
                   + (H_pad + n_hidden * H_pad + K_pad) * 4)
    total_w = num_blocks * per_block_w

    fast_path = (not force_streaming) and (total_w <= vmem_limit // 4)
    resident_w = total_w if fast_path else per_block_w

    # Batch tile: as large as the VMEM budget allows (on the streaming path the
    # whole weight stack is re-streamed once per batch tile, so fewer/larger
    # tiles directly cut weight HBM traffic).
    bytes_per_row = 16 * K_pad + 12 * H_pad   # f32 state copies + activation scratch
    avail = max(vmem_limit - 2 * resident_w, 2 * _SUBLANE * bytes_per_row)
    cap = max((avail // bytes_per_row) // _SUBLANE * _SUBLANE, _SUBLANE)
    B_tile = int(min(_round_up(B, _SUBLANE), cap, 1024))

    if fast_path and _round_up(B, B_tile) // B_tile == 1 and B_tile >= 2 * _SUBLANE:
        # Split a single oversized tile in two so both v7x TensorCores get work
        # (free here: weights are resident, so no extra weight DMA).
        B_tile = _round_up((B_tile + 1) // 2, _SUBLANE)

    B_pad = _round_up(B, B_tile)
    n_bt = B_pad // B_tile

    # Lane-dense f32 state slab: [x | t | context | zero pad].
    xtc = jnp.concatenate(
        [x.astype(jnp.float32),
         t.reshape(B, 1).astype(jnp.float32),
         context.astype(jnp.float32)], axis=-1)
    xtc = jnp.pad(xtc, ((0, B_pad - B), (0, K_pad - K)))

    flops = 2 * B_pad * num_blocks * (K_pad * H_pad + n_hidden * H_pad * H_pad
                                      + H_pad * K_pad)
    bytes_accessed = 2 * B_pad * K_pad * 4 + (1 if fast_path else n_bt) * total_w
    cost = pl.CostEstimate(flops=int(flops), transcendentals=0,
                           bytes_accessed=int(bytes_accessed))

    if fast_path:
        kernel = functools.partial(_fused_kernel, num_blocks, n_hidden,
                                   has_hidden, wdtype)
        grid = (n_bt,)
        state_spec = pl.BlockSpec((B_tile, K_pad), lambda b: (b, 0))
        in_specs = [state_spec,
                    pl.BlockSpec(w1p.shape, lambda b: (0, 0, 0)),
                    pl.BlockSpec(b1p.shape, lambda b: (0, 0, 0))]
        args = [xtc, w1p, b1p]
        if has_hidden:
            in_specs += [pl.BlockSpec(whp.shape, lambda b: (0, 0, 0, 0)),
                         pl.BlockSpec(bhp.shape, lambda b: (0, 0, 0, 0))]
            args += [whp, bhp]
        in_specs += [pl.BlockSpec(wop.shape, lambda b: (0, 0, 0)),
                     pl.BlockSpec(bop.shape, lambda b: (0, 0, 0))]
        args += [wop, bop]
        dim_sem = ("parallel",)
    else:
        # TODO(synk): for very large H or deep blocks, stream hidden-layer
        # weights per layer (third grid axis or pltpu.emit_pipeline) instead of
        # one (nh, H_pad, H_pad) slab per block.
        kernel = functools.partial(_streamed_kernel, n_hidden, has_hidden, wdtype)
        grid = (n_bt, num_blocks)
        state_spec = pl.BlockSpec((B_tile, K_pad), lambda b, k: (b, 0))
        in_specs = [state_spec,
                    pl.BlockSpec((1, K_pad, H_pad), lambda b, k: (k, 0, 0)),
                    pl.BlockSpec((1, 1, H_pad), lambda b, k: (k, 0, 0))]
        args = [xtc, w1p, b1p]
        if has_hidden:
            in_specs += [
                pl.BlockSpec((1, n_hidden, H_pad, H_pad), lambda b, k: (k, 0, 0, 0)),
                pl.BlockSpec((1, n_hidden, 1, H_pad), lambda b, k: (k, 0, 0, 0))]
            args += [whp, bhp]
        in_specs += [pl.BlockSpec((1, H_pad, K_pad), lambda b, k: (k, 0, 0)),
                     pl.BlockSpec((1, 1, K_pad), lambda b, k: (k, 0, 0))]
        args += [wop, bop]
        dim_sem = ("parallel", "arbitrary")

    out = pl.pallas_call(
        kernel,
        out_shape=jax.ShapeDtypeStruct((B_pad, K_pad), jnp.float32),
        grid=grid,
        in_specs=in_specs,
        out_specs=state_spec,
        input_output_aliases={0: 0},
        cost_estimate=cost,
        compiler_params=pltpu.CompilerParams(
            dimension_semantics=dim_sem,
            vmem_limit_bytes=int(vmem_limit)),
    )(*args)

    return out[:B, :D]


# ---------------------------------------------------------------------------
# Synthetic params + pure-JAX reference
# ---------------------------------------------------------------------------

def init_params(key, *, input_dim, context_dim, hidden_size, num_layers, num_blocks):
    """Synthetic weights stacked over blocks, PyTorch nn.Linear-style init.

    nn.Linear computes y = x @ W.T + b with W:(out,in); we store the (in,out)
    matrices the kernel multiplies with directly."""
    in_cat = input_dim + 1 + context_dim
    keys = jax.random.split(key, 6)

    def u(k, shape, fan_in):
        bound = 1.0 / jnp.sqrt(jnp.float32(fan_in))
        return jax.random.uniform(k, shape, jnp.float32, -bound, bound)

    w1 = u(keys[0], (num_blocks, in_cat, hidden_size), in_cat)
    b1 = u(keys[1], (num_blocks, 1, hidden_size), in_cat)
    n_hidden = num_layers - 1
    if n_hidden > 0:
        wh = u(keys[2], (num_blocks, n_hidden, hidden_size, hidden_size), hidden_size)
        bh = u(keys[3], (num_blocks, n_hidden, 1, hidden_size), hidden_size)
    else:
        wh, bh = None, None
    wo = u(keys[4], (num_blocks, hidden_size, input_dim), hidden_size)
    bo = u(keys[5], (num_blocks, 1, input_dim), hidden_size)
    return (w1, b1, wh, bh, wo, bo)


def resnet_reference(x, t, context, params, *, num_blocks, num_layers):
    """Pure-JAX reference mirroring the PyTorch module."""
    w1, b1, wh, bh, wo, bo = params
    B = x.shape[0]
    t2 = t.reshape(B, 1)
    for blk in range(num_blocks):
        xtc = jnp.concatenate([x, t2, context], axis=-1)
        h = jnp.maximum(xtc @ w1[blk] + b1[blk], 0.0)
        for layer in range(num_layers - 1):
            h = jnp.maximum(h @ wh[blk, layer] + bh[blk, layer], 0.0)
        x = h @ wo[blk] + bo[blk] + x
    return x


if __name__ == "__main__":
    B = 8
    INPUT_DIM = 4
    CONTEXT_DIM = 3
    HIDDEN = 32
    NUM_LAYERS = 2
    NUM_BLOCKS = 3

    key = jax.random.PRNGKey(0)
    kx, kt, kc, kp = jax.random.split(key, 4)
    x = jax.random.normal(kx, (B, INPUT_DIM), jnp.float32)
    t = jax.random.uniform(kt, (B,), jnp.float32)
    context = jax.random.normal(kc, (B, CONTEXT_DIM), jnp.float32)

    params = init_params(kp, input_dim=INPUT_DIM, context_dim=CONTEXT_DIM,
                         hidden_size=HIDDEN, num_layers=NUM_LAYERS,
                         num_blocks=NUM_BLOCKS)
    ref = resnet_reference(x, t, context, params,
                           num_blocks=NUM_BLOCKS, num_layers=NUM_LAYERS)

    # f32 weights (fast / fused path): tight check against the reference.
    prep_f32 = prepare_params(params, weight_dtype=jnp.float32)
    out_f32 = jax.block_until_ready(resnet_forward(x, t, context, prep_f32))
    assert out_f32.shape == (B, INPUT_DIM)
    assert jnp.allclose(out_f32, ref, atol=1e-4, rtol=1e-4), "f32 mismatch vs reference"

    # bf16 streamed weights (production path): relaxed tolerance.
    prep_bf16 = prepare_params(params, weight_dtype=jnp.bfloat16)
    out_bf16 = jax.block_until_ready(resnet_forward(x, t, context, prep_bf16))
    assert out_bf16.shape == (B, INPUT_DIM)
    assert jnp.allclose(out_bf16, ref, atol=5e-2, rtol=5e-2), "bf16 mismatch vs reference"

    # Exercise the per-block streaming path too (what large models would use).
    out_stream = jax.block_until_ready(
        resnet_forward(x, t, context, prep_bf16, force_streaming=True))
    assert out_stream.shape == (B, INPUT_DIM)
    assert jnp.allclose(out_stream, ref, atol=5e-2, rtol=5e-2), "streamed mismatch"

    print("KERNEL_OK")
</pallas_src>

<mosaic_0001>
module attributes {stable_mosaic.version = 11 : i64} {
  func.func @_fused_kernel(%arg0: i32, %arg1: memref<8x128xf32, #tpu.memory_space<vmem>>, %arg2: memref<3x128x128xf32, #tpu.memory_space<vmem>>, %arg3: memref<3x1x128xf32, #tpu.memory_space<vmem>>, %arg4: memref<3x1x128x128xf32, #tpu.memory_space<vmem>>, %arg5: memref<3x1x1x128xf32, #tpu.memory_space<vmem>>, %arg6: memref<3x128x128xf32, #tpu.memory_space<vmem>>, %arg7: memref<3x1x128xf32, #tpu.memory_space<vmem>>, %arg8: memref<8x128xf32, #tpu.memory_space<vmem>>) attributes {dimension_semantics = [#tpu.dimension_semantics<parallel>], iteration_bounds = array<i64: 1>, scalar_prefetch = 0 : i64, scratch_operands = 0 : i64, tpu.core_type = #tpu.core_type<tc>, window_params = [{transform_indices = @transform_0, window_bounds = array<i64: 8, 128>}, {pipeline_mode = #tpu.pipeline_mode<synchronous>, transform_indices = @transform_1, window_bounds = array<i64: 3, 128, 128>}, {pipeline_mode = #tpu.pipeline_mode<synchronous>, transform_indices = @transform_2, window_bounds = array<i64: 3, 1, 128>}, {pipeline_mode = #tpu.pipeline_mode<synchronous>, transform_indices = @transform_3, window_bounds = array<i64: 3, 1, 128, 128>}, {pipeline_mode = #tpu.pipeline_mode<synchronous>, transform_indices = @transform_4, window_bounds = array<i64: 3, 1, 1, 128>}, {pipeline_mode = #tpu.pipeline_mode<synchronous>, transform_indices = @transform_5, window_bounds = array<i64: 3, 128, 128>}, {pipeline_mode = #tpu.pipeline_mode<synchronous>, transform_indices = @transform_6, window_bounds = array<i64: 3, 1, 128>}, {transform_indices = @transform_7, window_bounds = array<i64: 8, 128>}]} {
    %c0 = arith.constant 0 : index
    %c0_0 = arith.constant 0 : index
    %0 = vector.load %arg1[%c0, %c0_0] : memref<8x128xf32, #tpu.memory_space<vmem>>, vector<8x128xf32>
    %c0_1 = arith.constant 0 : index
    %c0_2 = arith.constant 0 : index
    %c0_3 = arith.constant 0 : index
    %1 = vector.load %arg2[%c0_1, %c0_2, %c0_3] : memref<3x128x128xf32, #tpu.memory_space<vmem>>, vector<1x128x128xf32>
    %2 = vector.shape_cast %1 : vector<1x128x128xf32> to vector<128x128xf32>
    %cst = arith.constant dense<0.000000e+00> : vector<8x128xf32>
    %3 = tpu.matmul %0, %2, %cst {dimension_numbers = #tpu.dot_dimension_numbers<[1], [0], [0], [1], [0, 0, 1, 1], [], []>} : vector<8x128xf32>, vector<128x128xf32>, vector<8x128xf32> -> vector<8x128xf32>
    %c0_4 = arith.constant 0 : index
    %c0_5 = arith.constant 0 : index
    %c0_6 = arith.constant 0 : index
    %4 = vector.load %arg3[%c0_4, %c0_5, %c0_6] : memref<3x1x128xf32, #tpu.memory_space<vmem>>, vector<1x1x128xf32>
    %5 = vector.shape_cast %4 : vector<1x1x128xf32> to vector<1x128xf32>
    %6 = vector.broadcast %5 : vector<1x128xf32> to vector<8x128xf32>
    %7 = arith.addf %3, %6 : vector<8x128xf32>
    %cst_7 = arith.constant 0.000000e+00 : f32
    %8 = vector.broadcast %cst_7 : f32 to vector<8x128xf32>
    %9 = arith.maximumf %7, %8 : vector<8x128xf32>
    %c0_8 = arith.constant 0 : index
    %c0_9 = arith.constant 0 : index
    %c0_10 = arith.constant 0 : index
    %c0_11 = arith.constant 0 : index
    %10 = vector.load %arg4[%c0_8, %c0_9, %c0_10, %c0_11] : memref<3x1x128x128xf32, #tpu.memory_space<vmem>>, vector<1x1x128x128xf32>
    %11 = vector.shape_cast %10 : vector<1x1x128x128xf32> to vector<128x128xf32>
    %cst_12 = arith.constant dense<0.000000e+00> : vector<8x128xf32>
    %12 = tpu.matmul %9, %11, %cst_12 {dimension_numbers = #tpu.dot_dimension_numbers<[1], [0], [0], [1], [0, 0, 1, 1], [], []>} : vector<8x128xf32>, vector<128x128xf32>, vector<8x128xf32> -> vector<8x128xf32>
    %c0_13 = arith.constant 0 : index
    %c0_14 = arith.constant 0 : index
    %c0_15 = arith.constant 0 : index
    %c0_16 = arith.constant 0 : index
    %13 = vector.load %arg5[%c0_13, %c0_14, %c0_15, %c0_16] : memref<3x1x1x128xf32, #tpu.memory_space<vmem>>, vector<1x1x1x128xf32>
    %14 = vector.shape_cast %13 : vector<1x1x1x128xf32> to vector<1x128xf32>
    %15 = vector.broadcast %14 : vector<1x128xf32> to vector<8x128xf32>
    %16 = arith.addf %12, %15 : vector<8x128xf32>
    %cst_17 = arith.constant 0.000000e+00 : f32
    %17 = vector.broadcast %cst_17 : f32 to vector<8x128xf32>
    %18 = arith.maximumf %16, %17 : vector<8x128xf32>
    %c0_18 = arith.constant 0 : index
    %c0_19 = arith.constant 0 : index
    %c0_20 = arith.constant 0 : index
    %19 = vector.load %arg6[%c0_18, %c0_19, %c0_20] : memref<3x128x128xf32, #tpu.memory_space<vmem>>, vector<1x128x128xf32>
    %20 = vector.shape_cast %19 : vector<1x128x128xf32> to vector<128x128xf32>
    %cst_21 = arith.constant dense<0.000000e+00> : vector<8x128xf32>
    %21 = tpu.matmul %18, %20, %cst_21 {dimension_numbers = #tpu.dot_dimension_numbers<[1], [0], [0], [1], [0, 0, 1, 1], [], []>} : vector<8x128xf32>, vector<128x128xf32>, vector<8x128xf32> -> vector<8x128xf32>
    %22 = arith.addf %0, %21 : vector<8x128xf32>
    %c0_22 = arith.constant 0 : index
    %c0_23 = arith.constant 0 : index
    %c0_24 = arith.constant 0 : index
    %23 = vector.load %arg7[%c0_22, %c0_23, %c0_24] : memref<3x1x128xf32, #tpu.memory_space<vmem>>, vector<1x1x128xf32>
    %24 = vector.shape_cast %23 : vector<1x1x128xf32> to vector<1x128xf32>
    %25 = vector.broadcast %24 : vector<1x128xf32> to vector<8x128xf32>
    %26 = arith.addf %22, %25 : vector<8x128xf32>
    %c1 = arith.constant 1 : index
    %c0_25 = arith.constant 0 : index
    %c0_26 = arith.constant 0 : index
    %27 = vector.load %arg2[%c1, %c0_25, %c0_26] : memref<3x128x128xf32, #tpu.memory_space<vmem>>, vector<1x128x128xf32>
    %28 = vector.shape_cast %27 : vector<1x128x128xf32> to vector<128x128xf32>
    %cst_27 = arith.constant dense<0.000000e+00> : vector<8x128xf32>
    %29 = tpu.matmul %26, %28, %cst_27 {dimension_numbers = #tpu.dot_dimension_numbers<[1], [0], [0], [1], [0, 0, 1, 1], [], []>} : vector<8x128xf32>, vector<128x128xf32>, vector<8x128xf32> -> vector<8x128xf32>
    %c1_28 = arith.constant 1 : index
    %c0_29 = arith.constant 0 : index
    %c0_30 = arith.constant 0 : index
    %30 = vector.load %arg3[%c1_28, %c0_29, %c0_30] : memref<3x1x128xf32, #tpu.memory_space<vmem>>, vector<1x1x128xf32>
    %31 = vector.shape_cast %30 : vector<1x1x128xf32> to vector<1x128xf32>
    %32 = vector.broadcast %31 : vector<1x128xf32> to vector<8x128xf32>
    %33 = arith.addf %29, %32 : vector<8x128xf32>
    %cst_31 = arith.constant 0.000000e+00 : f32
    %34 = vector.broadcast %cst_31 : f32 to vector<8x128xf32>
    %35 = arith.maximumf %33, %34 : vector<8x128xf32>
    %c1_32 = arith.constant 1 : index
    %c0_33 = arith.constant 0 : index
    %c0_34 = arith.constant 0 : index
    %c0_35 = arith.constant 0 : index
    %36 = vector.load %arg4[%c1_32, %c0_33, %c0_34, %c0_35] : memref<3x1x128x128xf32, #tpu.memory_space<vmem>>, vector<1x1x128x128xf32>
    %37 = vector.shape_cast %36 : vector<1x1x128x128xf32> to vector<128x128xf32>
    %cst_36 = arith.constant dense<0.000000e+00> : vector<8x128xf32>
    %38 = tpu.matmul %35, %37, %cst_36 {dimension_numbers = #tpu.dot_dimension_numbers<[1], [0], [0], [1], [0, 0, 1, 1], [], []>} : vector<8x128xf32>, vector<128x128xf32>, vector<8x128xf32> -> vector<8x128xf32>
    %c1_37 = arith.constant 1 : index
    %c0_38 = arith.constant 0 : index
    %c0_39 = arith.constant 0 : index
    %c0_40 = arith.constant 0 : index
    %39 = vector.load %arg5[%c1_37, %c0_38, %c0_39, %c0_40] : memref<3x1x1x128xf32, #tpu.memory_space<vmem>>, vector<1x1x1x128xf32>
    %40 = vector.shape_cast %39 : vector<1x1x1x128xf32> to vector<1x128xf32>
    %41 = vector.broadcast %40 : vector<1x128xf32> to vector<8x128xf32>
    %42 = arith.addf %38, %41 : vector<8x128xf32>
    %cst_41 = arith.constant 0.000000e+00 : f32
    %43 = vector.broadcast %cst_41 : f32 to vector<8x128xf32>
    %44 = arith.maximumf %42, %43 : vector<8x128xf32>
    %c1_42 = arith.constant 1 : index
    %c0_43 = arith.constant 0 : index
    %c0_44 = arith.constant 0 : index
    %45 = vector.load %arg6[%c1_42, %c0_43, %c0_44] : memref<3x128x128xf32, #tpu.memory_space<vmem>>, vector<1x128x128xf32>
    %46 = vector.shape_cast %45 : vector<1x128x128xf32> to vector<128x128xf32>
    %cst_45 = arith.constant dense<0.000000e+00> : vector<8x128xf32>
    %47 = tpu.matmul %44, %46, %cst_45 {dimension_numbers = #tpu.dot_dimension_numbers<[1], [0], [0], [1], [0, 0, 1, 1], [], []>} : vector<8x128xf32>, vector<128x128xf32>, vector<8x128xf32> -> vector<8x128xf32>
    %48 = arith.addf %26, %47 : vector<8x128xf32>
    %c1_46 = arith.constant 1 : index
    %c0_47 = arith.constant 0 : index
    %c0_48 = arith.constant 0 : index
    %49 = vector.load %arg7[%c1_46, %c0_47, %c0_48] : memref<3x1x128xf32, #tpu.memory_space<vmem>>, vector<1x1x128xf32>
    %50 = vector.shape_cast %49 : vector<1x1x128xf32> to vector<1x128xf32>
    %51 = vector.broadcast %50 : vector<1x128xf32> to vector<8x128xf32>
    %52 = arith.addf %48, %51 : vector<8x128xf32>
    %c2 = arith.constant 2 : index
    %c0_49 = arith.constant 0 : index
    %c0_50 = arith.constant 0 : index
    %53 = vector.load %arg2[%c2, %c0_49, %c0_50] : memref<3x128x128xf32, #tpu.memory_space<vmem>>, vector<1x128x128xf32>
    %54 = vector.shape_cast %53 : vector<1x128x128xf32> to vector<128x128xf32>
    %cst_51 = arith.constant dense<0.000000e+00> : vector<8x128xf32>
    %55 = tpu.matmul %52, %54, %cst_51 {dimension_numbers = #tpu.dot_dimension_numbers<[1], [0], [0], [1], [0, 0, 1, 1], [], []>} : vector<8x128xf32>, vector<128x128xf32>, vector<8x128xf32> -> vector<8x128xf32>
    %c2_52 = arith.constant 2 : index
    %c0_53 = arith.constant 0 : index
    %c0_54 = arith.constant 0 : index
    %56 = vector.load %arg3[%c2_52, %c0_53, %c0_54] : memref<3x1x128xf32, #tpu.memory_space<vmem>>, vector<1x1x128xf32>
    %57 = vector.shape_cast %56 : vector<1x1x128xf32> to vector<1x128xf32>
    %58 = vector.broadcast %57 : vector<1x128xf32> to vector<8x128xf32>
    %59 = arith.addf %55, %58 : vector<8x128xf32>
    %cst_55 = arith.constant 0.000000e+00 : f32
    %60 = vector.broadcast %cst_55 : f32 to vector<8x128xf32>
    %61 = arith.maximumf %59, %60 : vector<8x128xf32>
    %c2_56 = arith.constant 2 : index
    %c0_57 = arith.constant 0 : index
    %c0_58 = arith.constant 0 : index
    %c0_59 = arith.constant 0 : index
    %62 = vector.load %arg4[%c2_56, %c0_57, %c0_58, %c0_59] : memref<3x1x128x128xf32, #tpu.memory_space<vmem>>, vector<1x1x128x128xf32>
    %63 = vector.shape_cast %62 : vector<1x1x128x128xf32> to vector<128x128xf32>
    %cst_60 = arith.constant dense<0.000000e+00> : vector<8x128xf32>
    %64 = tpu.matmul %61, %63, %cst_60 {dimension_numbers = #tpu.dot_dimension_numbers<[1], [0], [0], [1], [0, 0, 1, 1], [], []>} : vector<8x128xf32>, vector<128x128xf32>, vector<8x128xf32> -> vector<8x128xf32>
    %c2_61 = arith.constant 2 : index
    %c0_62 = arith.constant 0 : index
    %c0_63 = arith.constant 0 : index
    %c0_64 = arith.constant 0 : index
    %65 = vector.load %arg5[%c2_61, %c0_62, %c0_63, %c0_64] : memref<3x1x1x128xf32, #tpu.memory_space<vmem>>, vector<1x1x1x128xf32>
    %66 = vector.shape_cast %65 : vector<1x1x1x128xf32> to vector<1x128xf32>
    %67 = vector.broadcast %66 : vector<1x128xf32> to vector<8x128xf32>
    %68 = arith.addf %64, %67 : vector<8x128xf32>
    %cst_65 = arith.constant 0.000000e+00 : f32
    %69 = vector.broadcast %cst_65 : f32 to vector<8x128xf32>
    %70 = arith.maximumf %68, %69 : vector<8x128xf32>
    %c2_66 = arith.constant 2 : index
    %c0_67 = arith.constant 0 : index
    %c0_68 = arith.constant 0 : index
    %71 = vector.load %arg6[%c2_66, %c0_67, %c0_68] : memref<3x128x128xf32, #tpu.memory_space<vmem>>, vector<1x128x128xf32>
    %72 = vector.shape_cast %71 : vector<1x128x128xf32> to vector<128x128xf32>
    %cst_69 = arith.constant dense<0.000000e+00> : vector<8x128xf32>
    %73 = tpu.matmul %70, %72, %cst_69 {dimension_numbers = #tpu.dot_dimension_numbers<[1], [0], [0], [1], [0, 0, 1, 1], [], []>} : vector<8x128xf32>, vector<128x128xf32>, vector<8x128xf32> -> vector<8x128xf32>
    %74 = arith.addf %52, %73 : vector<8x128xf32>
    %c2_70 = arith.constant 2 : index
    %c0_71 = arith.constant 0 : index
    %c0_72 = arith.constant 0 : index
    %75 = vector.load %arg7[%c2_70, %c0_71, %c0_72] : memref<3x1x128xf32, #tpu.memory_space<vmem>>, vector<1x1x128xf32>
    %76 = vector.shape_cast %75 : vector<1x1x128xf32> to vector<1x128xf32>
    %77 = vector.broadcast %76 : vector<1x128xf32> to vector<8x128xf32>
    %78 = arith.addf %74, %77 : vector<8x128xf32>
    %c0_73 = arith.constant 0 : index
    %c0_74 = arith.constant 0 : index
    %79 = vector.load %arg8[%c0_73, %c0_74] : memref<8x128xf32, #tpu.memory_space<vmem>>, vector<8x128xf32>
    tpu.vector_store %arg8[%c0_73, %c0_74], %78 {strides = array<i32>} : memref<8x128xf32, #tpu.memory_space<vmem>>, vector<8x128xf32>,
    return
  }
  func.func @transform_0(%arg0: i32) -> (i32, i32) {
    %c0_i32 = arith.constant 0 : i32
    %c0_i32_0 = arith.constant 0 : i32
    return %arg0, %c0_i32 : i32, i32
  }
  func.func @transform_1(%arg0: i32) -> (i32, i32, i32) {
    %c0_i32 = arith.constant 0 : i32
    %c0_i32_0 = arith.constant 0 : i32
    %c0_i32_1 = arith.constant 0 : i32
    %c0_i32_2 = arith.constant 0 : i32
    return %c0_i32, %c0_i32_0, %c0_i32_1 : i32, i32, i32
  }
  func.func @transform_2(%arg0: i32) -> (i32, i32, i32) {
    %c0_i32 = arith.constant 0 : i32
    %c0_i32_0 = arith.constant 0 : i32
    %c0_i32_1 = arith.constant 0 : i32
    %c0_i32_2 = arith.constant 0 : i32
    return %c0_i32, %c0_i32_0, %c0_i32_1 : i32, i32, i32
  }
  func.func @transform_3(%arg0: i32) -> (i32, i32, i32, i32) {
    %c0_i32 = arith.constant 0 : i32
    %c0_i32_0 = arith.constant 0 : i32
    %c0_i32_1 = arith.constant 0 : i32
    %c0_i32_2 = arith.constant 0 : i32
    %c0_i32_3 = arith.constant 0 : i32
    return %c0_i32, %c0_i32_0, %c0_i32_1, %c0_i32_2 : i32, i32, i32, i32
  }
  func.func @transform_4(%arg0: i32) -> (i32, i32, i32, i32) {
    %c0_i32 = arith.constant 0 : i32
    %c0_i32_0 = arith.constant 0 : i32
    %c0_i32_1 = arith.constant 0 : i32
    %c0_i32_2 = arith.constant 0 : i32
    %c0_i32_3 = arith.constant 0 : i32
    return %c0_i32, %c0_i32_0, %c0_i32_1, %c0_i32_2 : i32, i32, i32, i32
  }
  func.func @transform_5(%arg0: i32) -> (i32, i32, i32) {
    %c0_i32 = arith.constant 0 : i32
    %c0_i32_0 = arith.constant 0 : i32
    %c0_i32_1 = arith.constant 0 : i32
    %c0_i32_2 = arith.constant 0 : i32
    return %c0_i32, %c0_i32_0, %c0_i32_1 : i32, i32, i32
  }
  func.func @transform_6(%arg0: i32) -> (i32, i32, i32) {
    %c0_i32 = arith.constant 0 : i32
    %c0_i32_0 = arith.constant 0 : i32
    %c0_i32_1 = arith.constant 0 : i32
    %c0_i32_2 = arith.constant 0 : i32
    return %c0_i32, %c0_i32_0, %c0_i32_1 : i32, i32, i32
  }
  func.func @transform_7(%arg0: i32) -> (i32, i32) {
    %c0_i32 = arith.constant 0 : i32
    %c0_i32_0 = arith.constant 0 : i32
    return %arg0, %c0_i32 : i32, i32
  }
}

</mosaic_0001>

<bundles_post_ra>
// kernel: resnet_forward.1
= control target key start
LH: loop header
LB: loop body
LE: loop exit
PB: predicated region body
PF: predicated region fallthrough
CT: control target
= control target key end

     0   :  { %12 = vsyncpa [#allocation3], 0  ;;  %s1753_s0 = inlined_call_operand.vmem [shape: f32[8,128], index: 0, kind: input, shape index: {}, may-alias: {0,7}]   ;;  %s1754_s1 = inlined_call_operand.hbm [shape: f32[3,128,128], index: 1, kind: input, shape index: {}]   ;;  %s1755_s2 = inlined_call_operand.vmem [shape: f32[3,1,128], index: 2, kind: input, shape index: {}]   ;;  %s1756_s3 = inlined_call_operand.hbm [shape: f32[3,1,128,128], index: 3, kind: input, shape index: {}]   ;;  %s1757_s4 = inlined_call_operand.vmem [shape: f32[3,1,1,128], index: 4, kind: input, shape index: {}]   ;;  %s1758_s5 = inlined_call_operand.hbm [shape: f32[3,128,128], index: 5, kind: input, shape index: {}]   ;;  %s1759_s6 = inlined_call_operand.vmem [shape: f32[3,1,128], index: 6, kind: input, shape index: {}]   ;;  %s1760_s7 = inlined_call_operand.vmem [shape: f32[8,128], index: 7, kind: output, shape index: {}, may-alias: {0,7}]  }
   0x1   :  { %13 = vsyncpa [#allocation5], 0  ;;  %s1490_s24 = smov [#allocation4]   ;;  %s1491_s26 = smov [#allocation2]  }
   0x2   :  { %s35_s25 = sshll.u32 %s1490_s24, 4  ;;  %s21_s27 = sshll.u32 %s1491_s26, 4  ;;  %s36_s25 = int_to_ptr.vmem [resolvable:$true] %s35_s25  ;;  %s22_s27 = int_to_ptr.vmem [resolvable:$true] %s21_s27 }
   0x3   :  { %s1434_s28 = scalar_lea.vmem %s36_s25, 6144  ;;  %p1439_p1 = scmp.lt.s32.totalorder %s36_s25, %s36_s25 }
   0x4   :  { %p1435_p0 = scmp.ne.s32.totalorder %s36_s25, %s1434_s28  ;;  %p1440_p2 = scmp.lt.s32.totalorder %s1434_s28, %s1434_s28 }
   0x6   :  { %p1441_p3 = por %p1440_p2, %p1439_p1 }
   0x8   :  { %p1442_p4 = pnand %p1441_p3, %p1435_p0 }
   0xa   :  { %1445 = shalt.err (!%p1442_p4)
}
   0xb   :  { %s1492_s29 = smov 128   ;;  %s1493_s30 = smov 8  }
   0xc   :  { %41 = dma.hbm_to_vmem [thread:$0]  %s1756_s3, 6144, %s36_s25, [#allocation5], %s1492_s29, %s1492_s29, %s1493_s30  }
   0xd   :  { %s1454_s10 = scalar_lea.vmem %s22_s27, 6144  ;;  %p1459_p6 = scmp.lt.s32.totalorder %s22_s27, %s22_s27 }
   0xe   :  { %p1455_p5 = scmp.ne.s32.totalorder %s22_s27, %s1454_s10  ;;  %p1460_p7 = scmp.lt.s32.totalorder %s1454_s10, %s1454_s10 }
  0x10   :  { %p1461_p8 = por %p1460_p7, %p1459_p6 }
  0x12   :  { %p1462_p9 = pnand %p1461_p8, %p1455_p5 }
  0x14   :  { %1465 = shalt.err (!%p1462_p9)
}
  0x15   :  { %27 = dma.hbm_to_vmem [thread:$0]  %s1754_s1, 6144, %s22_s27, [#allocation3], %s1492_s29, %s1492_s29, %s1493_s30  }
  0x16   :  { %s1494_s13 = smov [#allocation6]  }
  0x17   :  { %s49_s14 = sshll.u32 %s1494_s13, 4  ;;  %s50_s14 = int_to_ptr.vmem [resolvable:$true] %s49_s14 }
  0x18   :  { %s1474_s15 = scalar_lea.vmem %s50_s14, 6144  ;;  %p1479_p11 = scmp.lt.s32.totalorder %s50_s14, %s50_s14 }
  0x19   :  { %p1475_p10 = scmp.ne.s32.totalorder %s50_s14, %s1474_s15  ;;  %p1480_p12 = scmp.lt.s32.totalorder %s1474_s15, %s1474_s15 }
  0x1b   :  { %p1481_p13 = por %p1480_p12, %p1479_p11 }
  0x1d   :  { %p1482_p0 = pnand %p1481_p13, %p1475_p10 }
  0x1f   :  { %1485 = shalt.err (!%p1482_p0)
}
  0x20   :  { %55 = dma.hbm_to_vmem [thread:$0]  %s1758_s5, 6144, %s50_s14, [#allocation5], %s1492_s29, %s1492_s29, %s1493_s30  }
  0x21   :  { %1486 = dma.done.wait [#allocation3], 6144  }
  0x22   :  { %1487 = vsyncadd [#allocation3], 4294961152 }
  0x23   :  { %1488 = dma.done.wait [#allocation5], 12288  }
  0x24   :  { %1489 = vsyncadd [#allocation5], 4294955008  ;;  %v1495_v0 = vmov 0.0   ;;  %vm1496_vm0 = vmmov 0   ;;  %v83_v1 = vld [vmem:[#allocation2 + $0x78] sm:$0xff]  ;;  %v82_v2 = vld [vmem:[#allocation2 + $0x70] sm:$0xff] }
  0x25   :  { %1104 = vmatprep.subr.mxu0 %v1495_v0  ;;  %1136 = vmatprep.mubr.msk.f32.mxu0 %vm1496_vm0, %v1495_v0  ;;  %v81_v3 = vld [vmem:[#allocation2 + $0x68] sm:$0xff]  ;;  %v80_v4 = vld [vmem:[#allocation2 + $0x60] sm:$0xff]  ;;  %v177_v5 = vld [vmem:[#allocation4 + $0x78] sm:$0xff] }
  0x26   :  { %1139 = vmatprep.subr.mxu1 %v1495_v0  ;;  %1171 = vmatprep.mubr.msk.f32.mxu1 %vm1496_vm0, %v1495_v0  ;;  %v79_v6 = vld [vmem:[#allocation2 + $0x58] sm:$0xff]  ;;  %v176_v7 = vld [vmem:[#allocation4 + $0x70] sm:$0xff]  ;;  %v175_v8 = vld [vmem:[#allocation4 + $0x68] sm:$0xff] }
  0x27   :  { %1105 = vmatpush3.msra.mxu0 %v83_v1  ;;  %1140 = vmatpush3.msra.mxu1 %v177_v5  ;;  %v78_v9 = vld [vmem:[#allocation2 + $0x50] sm:$0xff]  ;;  %v174_v10 = vld [vmem:[#allocation4 + $0x60] sm:$0xff]  ;;  %v77_v11 = vld [vmem:[#allocation2 + $0x48] sm:$0xff] }
  0x28   :  { %1106 = vmatprep.subr.mxu0 %v1495_v0  ;;  %1141 = vmatprep.subr.mxu1 %v1495_v0  ;;  %v173_v12 = vld [vmem:[#allocation4 + $0x58] sm:$0xff]  ;;  %v76_v13 = vld [vmem:[#allocation2 + $0x40] sm:$0xff]  ;;  %v172_v14 = vld [vmem:[#allocation4 + $0x50] sm:$0xff] }
  0x29   :  { %1107 = vmatpush3.msra.mxu0 %v82_v2  ;;  %1142 = vmatpush3.msra.mxu1 %v176_v7  ;;  %v75_v15 = vld [vmem:[#allocation2 + $0x38] sm:$0xff]  ;;  %v171_v16 = vld [vmem:[#allocation4 + $0x48] sm:$0xff]  ;;  %v74_v17 = vld [vmem:[#allocation2 + $0x30] sm:$0xff] }
  0x2a   :  { %1108 = vmatprep.subr.mxu0 %v1495_v0  ;;  %1143 = vmatprep.subr.mxu1 %v1495_v0  ;;  %v170_v18 = vld [vmem:[#allocation4 + $0x40] sm:$0xff]  ;;  %v73_v19 = vld [vmem:[#allocation2 + $0x28] sm:$0xff]  ;;  %v169_v20 = vld [vmem:[#allocation4 + $0x38] sm:$0xff] }
  0x2b   :  { %1109 = vmatpush3.msra.mxu0 %v81_v3  ;;  %1144 = vmatpush3.msra.mxu1 %v175_v8  ;;  %v72_v21 = vld [vmem:[#allocation2 + $0x20] sm:$0xff]  ;;  %v168_v22 = vld [vmem:[#allocation4 + $0x30] sm:$0xff]  ;;  %v71_v23 = vld [vmem:[#allocation2 + $0x18] sm:$0xff] }
  0x2c   :  { %1110 = vmatprep.subr.mxu0 %v1495_v0  ;;  %1145 = vmatprep.subr.mxu1 %v1495_v0  ;;  %v167_v24 = vld [vmem:[#allocation4 + $0x28] sm:$0xff]  ;;  %v70_v25 = vld [vmem:[#allocation2 + $0x10] sm:$0xff]  ;;  %v166_v26 = vld [vmem:[#allocation4 + $0x20] sm:$0xff] }
  0x2d   :  { %1111 = vmatpush3.msra.mxu0 %v80_v4  ;;  %1146 = vmatpush3.msra.mxu1 %v174_v10  ;;  %v69_v27 = vld [vmem:[#allocation2 + $0x8] sm:$0xff]  ;;  %v165_v28 = vld [vmem:[#allocation4 + $0x18] sm:$0xff]  ;;  %v68_v29 = vld [vmem:[#allocation2] sm:$0xff] }
  0x2e   :  { %1112 = vmatprep.subr.mxu0 %v1495_v0  ;;  %1147 = vmatprep.subr.mxu1 %v1495_v0  ;;  %v1580_v30 = vld [vmem:[%s1753_s0] sm:$0xff]  ;;  %v164_v31 = vld [vmem:[#allocation4 + $0x10] sm:$0xff]  ;;  %v163_v32 = vld [vmem:[#allocation4 + $0x8] sm:$0xff] }
  0x2f   :  { %1113 = vmatpush3.msra.mxu0 %v79_v6  ;;  %1148 = vmatpush3.msra.mxu1 %v173_v12  ;;  %v162_v33 = vld [vmem:[#allocation4] sm:$0xff]  ;;  %v271_v34 = vld [vmem:[#allocation6 + $0x78] sm:$0xff]  ;;  %v270_v35 = vld [vmem:[#allocation6 + $0x70] sm:$0xff] }
  0x30   :  { %1114 = vmatprep.subr.mxu0 %v1495_v0  ;;  %1149 = vmatprep.subr.mxu1 %v1495_v0  ;;  %v269_v36 = vld [vmem:[#allocation6 + $0x68] sm:$0xff]  ;;  %v268_v37 = vld [vmem:[#allocation6 + $0x60] sm:$0xff]  ;;  %v267_v38 = vld [vmem:[#allocation6 + $0x58] sm:$0xff] }
  0x31   :  { %1115 = vmatpush3.msra.mxu0 %v78_v9  ;;  %1150 = vmatpush3.msra.mxu1 %v172_v14  ;;  %v266_v39 = vld [vmem:[#allocation6 + $0x50] sm:$0xff]  ;;  %v265_v40 = vld [vmem:[#allocation6 + $0x48] sm:$0xff]  ;;  %v264_v41 = vld [vmem:[#allocation6 + $0x40] sm:$0xff] }
  0x32   :  { %1116 = vmatprep.subr.mxu0 %v1495_v0  ;;  %1151 = vmatprep.subr.mxu1 %v1495_v0  ;;  %v263_v42 = vld [vmem:[#allocation6 + $0x38] sm:$0xff]  ;;  %v262_v43 = vld [vmem:[#allocation6 + $0x30] sm:$0xff]  ;;  %v261_v44 = vld [vmem:[#allocation6 + $0x28] sm:$0xff] }
  0x33   :  { %1117 = vmatpush3.msra.mxu0 %v77_v11  ;;  %1152 = vmatpush3.msra.mxu1 %v171_v16  ;;  %v260_v45 = vld [vmem:[#allocation6 + $0x20] sm:$0xff]  ;;  %v259_v46 = vld [vmem:[#allocation6 + $0x18] sm:$0xff]  ;;  %v258_v52 = vld [vmem:[#allocation6 + $0x10] sm:$0xff] }
  0x34   :  { %1118 = vmatprep.subr.mxu0 %v1495_v0  ;;  %1153 = vmatprep.subr.mxu1 %v1495_v0  ;;  %v936_v47 = vld [vmem:[%s1755_s2] ss:$0 sm:$0xff]  ;;  %v257_v53 = vld [vmem:[#allocation6 + $0x8] sm:$0xff]  ;;  %v367_v55 = vld [vmem:[#allocation2 + $0xf8] sm:$0xff] }
  0x35   :  { %1119 = vmatpush3.msra.mxu0 %v76_v13  ;;  %1154 = vmatpush3.msra.mxu1 %v170_v18  ;;  %v256_v54 = vld [vmem:[#allocation6] sm:$0xff]  ;;  %v366_v56 = vld [vmem:[#allocation2 + $0xf0] sm:$0xff]  ;;  %v365_v57 = vld [vmem:[#allocation2 + $0xe8] sm:$0xff] }
  0x36   :  { %1120 = vmatprep.subr.mxu0 %v1495_v0  ;;  %1155 = vmatprep.subr.mxu1 %v1495_v0  ;;  %v364_v58 = vld [vmem:[#allocation2 + $0xe0] sm:$0xff]  ;;  %v363_v59 = vld [vmem:[#allocation2 + $0xd8] sm:$0xff]  ;;  %v362_v60 = vld [vmem:[#allocation2 + $0xd0] sm:$0xff] }
  0x37   :  { %1121 = vmatpush3.msra.mxu0 %v75_v15  ;;  %1156 = vmatpush3.msra.mxu1 %v169_v20  ;;  %v361_v61 = vld [vmem:[#allocation2 + $0xc8] sm:$0xff]  ;;  %v360_v62 = vld [vmem:[#allocation2 + $0xc0] sm:$0xff]  ;;  %v359_v63 = vld [vmem:[#allocation2 + $0xb8] sm:$0xff] }
  0x38   :  { %1122 = vmatprep.subr.mxu0 %v1495_v0  ;;  %1157 = vmatprep.subr.mxu1 %v1495_v0  ;;  %v358_v1 = vld [vmem:[#allocation2 + $0xb0] sm:$0xff]  ;;  %v357_v2 = vld [vmem:[#allocation2 + $0xa8] sm:$0xff]  ;;  %v356_v3 = vld [vmem:[#allocation2 + $0xa0] sm:$0xff] }
  0x39   :  { %1123 = vmatpush3.msra.mxu0 %v74_v17  ;;  %1158 = vmatpush3.msra.mxu1 %v168_v22  ;;  %v355_v4 = vld [vmem:[#allocation2 + $0x98] sm:$0xff]  ;;  %v937_v5 = vld [vmem:[%s1757_s4] ss:$0 sm:$0xff]  ;;  %v354_v10 = vld [vmem:[#allocation2 + $0x90] sm:$0xff] }
  0x3a   :  { %1124 = vmatprep.subr.mxu0 %v1495_v0  ;;  %1159 = vmatprep.subr.mxu1 %v1495_v0  ;;  %v353_v11 = vld [vmem:[#allocation2 + $0x88] sm:$0xff]  ;;  %v352_v12 = vld [vmem:[#allocation2 + $0x80] sm:$0xff]  ;;  %v463_v13 = vld [vmem:[#allocation4 + $0xf8] sm:$0xff] }
  0x3b   :  { %1125 = vmatpush3.msra.mxu0 %v73_v19  ;;  %1160 = vmatpush3.msra.mxu1 %v167_v24  ;;  %v462_v14 = vld [vmem:[#allocation4 + $0xf0] sm:$0xff]  ;;  %v461_v15 = vld [vmem:[#allocation4 + $0xe8] sm:$0xff]  ;;  %v460_v16 = vld [vmem:[#allocation4 + $0xe0] sm:$0xff] }
  0x3c   :  { %1126 = vmatprep.subr.mxu0 %v1495_v0  ;;  %1161 = vmatprep.subr.mxu1 %v1495_v0  ;;  %v459_v17 = vld [vmem:[#allocation4 + $0xd8] sm:$0xff]  ;;  %v458_v18 = vld [vmem:[#allocation4 + $0xd0] sm:$0xff]  ;;  %v457_v19 = vld [vmem:[#allocation4 + $0xc8] sm:$0xff] }
  0x3d   :  { %1127 = vmatpush3.msra.mxu0 %v72_v21  ;;  %1162 = vmatpush3.msra.mxu1 %v166_v26  ;;  %v456_v20 = vld [vmem:[#allocation4 + $0xc0] sm:$0xff]  ;;  %v455_v21 = vld [vmem:[#allocation4 + $0xb8] sm:$0xff]  ;;  %v454_v22 = vld [vmem:[#allocation4 + $0xb0] sm:$0xff] }
  0x3e   :  { %1128 = vmatprep.subr.mxu0 %v1495_v0  ;;  %1163 = vmatprep.subr.mxu1 %v1495_v0  ;;  %v452_v24 = vld [vmem:[#allocation4 + $0xa0] sm:$0xff] }
  0x3f   :  { %1129 = vmatpush3.msra.mxu0 %v71_v23  ;;  %1164 = vmatpush3.msra.mxu1 %v165_v28  ;;  %v453_v23 = vld [vmem:[#allocation4 + $0xa8] sm:$0xff] }
  0x40   :  { %1130 = vmatprep.subr.mxu0 %v1495_v0  ;;  %1165 = vmatprep.subr.mxu1 %v1495_v0 }
  0x41   :  { %1131 = vmatpush3.msra.mxu0 %v70_v25  ;;  %1166 = vmatpush3.msra.mxu1 %v164_v31  ;;  %v451_v25 = vld [vmem:[#allocation4 + $0x98] sm:$0xff] }
  0x42   :  { %1132 = vmatprep.subr.mxu0 %v1495_v0  ;;  %1167 = vmatprep.subr.mxu1 %v1495_v0 }
  0x43   :  { %1133 = vmatpush3.msra.mxu0 %v69_v27  ;;  %1168 = vmatpush3.msra.mxu1 %v163_v32  ;;  %v938_v27 = vld [vmem:[%s1759_s6] ss:$0 sm:$0xff]  ;;  %v450_v32 = vld [vmem:[#allocation4 + $0x90] sm:$0xff] }
  0x44   :  { %1134 = vmatprep.subr.mxu0 %v1495_v0  ;;  %1169 = vmatprep.subr.mxu1 %v1495_v0 }
  0x45   :  { %1135 = vmatpush3.msra.mxu0 %v68_v29  ;;  %1170 = vmatpush3.msra.mxu1 %v162_v33  ;;  %v449_v33 = vld [vmem:[#allocation4 + $0x88] sm:$0xff] }
  0x46   :  { %1137 = vmatmul.mubr.f32.vlgmr.msra.gmra.mxu0 %v1580_v30  ;;  %1174 = vmatprep.subr.mxu0 %v1495_v0 }
  0x47   :  { %1206 = vmatprep.mubr.msk.f32.mxu0 %vm1496_vm0, %v1495_v0  ;;  %1209 = vmatprep.subr.mxu1 %v1495_v0 }
  0x48   :  { %1175 = vmatpush3.msra.mxu0 %v271_v34  ;;  %v448_v34 = vld [vmem:[#allocation4 + $0x80] sm:$0xff] }
  0x49   :  { %1176 = vmatprep.subr.mxu0 %v1495_v0 }
  0x4a   :  { %1177 = vmatpush3.msra.mxu0 %v270_v35  ;;  %v559_v35 = vld [vmem:[#allocation6 + $0xf8] sm:$0xff] }
  0x4b   :  { %1178 = vmatprep.subr.mxu0 %v1495_v0 }
  0x4c   :  { %1179 = vmatpush3.msra.mxu0 %v269_v36  ;;  %v557_v36 = vld [vmem:[#allocation6 + $0xe8] sm:$0xff] }
  0x4d   :  { %1180 = vmatprep.subr.mxu0 %v1495_v0 }
  0x4e   :  { %1181 = vmatpush3.msra.mxu0 %v268_v37  ;;  %v556_v37 = vld [vmem:[#allocation6 + $0xe0] sm:$0xff] }
  0x4f   :  { %1182 = vmatprep.subr.mxu0 %v1495_v0 }
  0x50   :  { %1183 = vmatpush3.msra.mxu0 %v267_v38  ;;  %v555_v38 = vld [vmem:[#allocation6 + $0xd8] sm:$0xff] }
  0x51   :  { %1184 = vmatprep.subr.mxu0 %v1495_v0 }
  0x52   :  { %1185 = vmatpush3.msra.mxu0 %v266_v39  ;;  %v554_v39 = vld [vmem:[#allocation6 + $0xd0] sm:$0xff] }
  0x53   :  { %1186 = vmatprep.subr.mxu0 %v1495_v0 }
  0x54   :  { %1187 = vmatpush3.msra.mxu0 %v265_v40  ;;  %v553_v40 = vld [vmem:[#allocation6 + $0xc8] sm:$0xff] }
  0x55   :  { %1188 = vmatprep.subr.mxu0 %v1495_v0 }
  0x56   :  { %1189 = vmatpush3.msra.mxu0 %v264_v41  ;;  %v552_v41 = vld [vmem:[#allocation6 + $0xc0] sm:$0xff] }
  0x57   :  { %1190 = vmatprep.subr.mxu0 %v1495_v0 }
  0x58   :  { %1191 = vmatpush3.msra.mxu0 %v263_v42  ;;  %v551_v42 = vld [vmem:[#allocation6 + $0xb8] sm:$0xff] }
  0x59   :  { %1192 = vmatprep.subr.mxu0 %v1495_v0 }
  0x5a   :  { %1193 = vmatpush3.msra.mxu0 %v262_v43  ;;  %v550_v43 = vld [vmem:[#allocation6 + $0xb0] sm:$0xff] }
  0x5b   :  { %1194 = vmatprep.subr.mxu0 %v1495_v0 }
  0x5c   :  { %1195 = vmatpush3.msra.mxu0 %v261_v44  ;;  %v549_v44 = vld [vmem:[#allocation6 + $0xa8] sm:$0xff] }
  0x5d   :  { %1196 = vmatprep.subr.mxu0 %v1495_v0 }
  0x5e   :  { %1197 = vmatpush3.msra.mxu0 %v260_v45  ;;  %v548_v45 = vld [vmem:[#allocation6 + $0xa0] sm:$0xff] }
  0x5f   :  { %1198 = vmatprep.subr.mxu0 %v1495_v0 }
  0x60   :  { %1199 = vmatpush3.msra.mxu0 %v259_v46  ;;  %v547_v46 = vld [vmem:[#allocation6 + $0x98] sm:$0xff] }
  0x61   :  { %1200 = vmatprep.subr.mxu0 %v1495_v0 }
  0x62   :  { %1201 = vmatpush3.msra.mxu0 %v258_v52  ;;  %v546_v52 = vld [vmem:[#allocation6 + $0x90] sm:$0xff] }
  0x63   :  { %1202 = vmatprep.subr.mxu0 %v1495_v0 }
  0x64   :  { %1203 = vmatpush3.msra.mxu0 %v257_v53  ;;  %v545_v53 = vld [vmem:[#allocation6 + $0x88] sm:$0xff] }
  0x65   :  { %1204 = vmatprep.subr.mxu0 %v1495_v0 }
  0x66   :  { %1205 = vmatpush3.msra.mxu0 %v256_v54  ;;  %v544_v54 = vld [vmem:[#allocation6 + $0x80] sm:$0xff] }
  0x67   :  { %1244 = vmatprep.subr.mxu0 %v1495_v0 }
 0x106   :  { %v157_v48 = vpop.f32.mrf.mxu0 }
 0x107   :  { %v158_v49 = vadd.f32 %v936_v47, %v157_v48  ;;  %v940_v47 = vld [vmem:[%s1755_s2 + $0x1] ss:$0 sm:$0xff] }
 0x108   :  { %v1138_v50 = vpop.f32.mrf.mxu0 }
 0x109   :  { %v161_v51 = vmax.f32 %v158_v49, 0.0 }
 0x10b   :  { %1172 = vmatmul.mubr.f32.vlgmr.msra.gmra.mxu1 %v161_v51 }
 0x10c   :  { %1241 = vmatprep.mubr.msk.f32.mxu1 %vm1496_vm0, %v1495_v0  ;;  %1210 = vmatpush3.msra.mxu1 %v367_v55  ;;  %v656_v55 = vld [vmem:[#allocation2 + $0x178] sm:$0xff] }
 0x10d   :  { %1211 = vmatprep.subr.mxu1 %v1495_v0 }
 0x10e   :  { %1212 = vmatpush3.msra.mxu1 %v366_v56  ;;  %v655_v56 = vld [vmem:[#allocation2 + $0x170] sm:$0xff] }
 0x10f   :  { %1213 = vmatprep.subr.mxu1 %v1495_v0 }
 0x110   :  { %1214 = vmatpush3.msra.mxu1 %v365_v57  ;;  %v654_v57 = vld [vmem:[#allocation2 + $0x168] sm:$0xff] }
 0x111   :  { %1215 = vmatprep.subr.mxu1 %v1495_v0 }
 0x112   :  { %1216 = vmatpush3.msra.mxu1 %v364_v58  ;;  %v653_v58 = vld [vmem:[#allocation2 + $0x160] sm:$0xff] }
 0x113   :  { %1217 = vmatprep.subr.mxu1 %v1495_v0 }
 0x114   :  { %1218 = vmatpush3.msra.mxu1 %v363_v59  ;;  %v652_v59 = vld [vmem:[#allocation2 + $0x158] sm:$0xff] }
 0x115   :  { %1219 = vmatprep.subr.mxu1 %v1495_v0 }
 0x116   :  { %1220 = vmatpush3.msra.mxu1 %v362_v60  ;;  %v651_v60 = vld [vmem:[#allocation2 + $0x150] sm:$0xff] }
 0x117   :  { %1221 = vmatprep.subr.mxu1 %v1495_v0 }
 0x118   :  { %1222 = vmatpush3.msra.mxu1 %v361_v61  ;;  %v650_v61 = vld [vmem:[#allocation2 + $0x148] sm:$0xff] }
 0x119   :  { %1223 = vmatprep.subr.mxu1 %v1495_v0 }
 0x11a   :  { %1224 = vmatpush3.msra.mxu1 %v360_v62  ;;  %v649_v62 = vld [vmem:[#allocation2 + $0x140] sm:$0xff] }
 0x11b   :  { %1225 = vmatprep.subr.mxu1 %v1495_v0 }
 0x11c   :  { %1226 = vmatpush3.msra.mxu1 %v359_v63  ;;  %v648_v63 = vld [vmem:[#allocation2 + $0x138] sm:$0xff] }
 0x11d   :  { %1227 = vmatprep.subr.mxu1 %v1495_v0 }
 0x11e   :  { %1228 = vmatpush3.msra.mxu1 %v358_v1  ;;  %v647_v1 = vld [vmem:[#allocation2 + $0x130] sm:$0xff] }
 0x11f   :  { %1229 = vmatprep.subr.mxu1 %v1495_v0 }
 0x120   :  { %1230 = vmatpush3.msra.mxu1 %v357_v2  ;;  %v646_v2 = vld [vmem:[#allocation2 + $0x128] sm:$0xff] }
 0x121   :  { %1231 = vmatprep.subr.mxu1 %v1495_v0 }
 0x122   :  { %1232 = vmatpush3.msra.mxu1 %v356_v3  ;;  %v645_v3 = vld [vmem:[#allocation2 + $0x120] sm:$0xff] }
 0x123   :  { %1233 = vmatprep.subr.mxu1 %v1495_v0 }
 0x124   :  { %1234 = vmatpush3.msra.mxu1 %v355_v4  ;;  %v644_v4 = vld [vmem:[#allocation2 + $0x118] sm:$0xff] }
 0x125   :  { %1235 = vmatprep.subr.mxu1 %v1495_v0 }
 0x126   :  { %1236 = vmatpush3.msra.mxu1 %v354_v10  ;;  %v643_v10 = vld [vmem:[#allocation2 + $0x110] sm:$0xff] }
 0x127   :  { %1237 = vmatprep.subr.mxu1 %v1495_v0 }
 0x128   :  { %1238 = vmatpush3.msra.mxu1 %v353_v11  ;;  %v642_v11 = vld [vmem:[#allocation2 + $0x108] sm:$0xff] }
 0x129   :  { %1239 = vmatprep.subr.mxu1 %v1495_v0 }
 0x12a   :  { %1240 = vmatpush3.msra.mxu1 %v352_v12  ;;  %v641_v12 = vld [vmem:[#allocation2 + $0x100] sm:$0xff] }
 0x12b   :  { %1279 = vmatprep.subr.mxu1 %v1495_v0 }
 0x1cb   :  { %v251_v6 = vpop.f32.mrf.mxu1 }
 0x1cc   :  { %v252_v7 = vadd.f32 %v937_v5, %v251_v6  ;;  %v942_v5 = vld [vmem:[%s1757_s4 + $0x1] ss:$0 sm:$0xff] }
 0x1cd   :  { %v1173_v8 = vpop.f32.mrf.mxu1 }
 0x1ce   :  { %v255_v9 = vmax.f32 %v252_v7, 0.0 }
 0x1d0   :  { %1207 = vmatmul.mubr.f32.vlgmr.msra.gmra.mxu0 %v255_v9 }
 0x1d1   :  { %1276 = vmatprep.mubr.msk.f32.mxu0 %vm1496_vm0, %v1495_v0  ;;  %1245 = vmatpush3.msra.mxu0 %v463_v13  ;;  %v752_v13 = vld [vmem:[#allocation4 + $0x178] sm:$0xff] }
 0x1d2   :  { %1246 = vmatprep.subr.mxu0 %v1495_v0 }
 0x1d3   :  { %1247 = vmatpush3.msra.mxu0 %v462_v14  ;;  %v751_v14 = vld [vmem:[#allocation4 + $0x170] sm:$0xff] }
 0x1d4   :  { %1248 = vmatprep.subr.mxu0 %v1495_v0 }
 0x1d5   :  { %1249 = vmatpush3.msra.mxu0 %v461_v15  ;;  %v750_v15 = vld [vmem:[#allocation4 + $0x168] sm:$0xff] }
 0x1d6   :  { %1250 = vmatprep.subr.mxu0 %v1495_v0 }
 0x1d7   :  { %1251 = vmatpush3.msra.mxu0 %v460_v16  ;;  %v749_v16 = vld [vmem:[#allocation4 + $0x160] sm:$0xff] }
 0x1d8   :  { %1252 = vmatprep.subr.mxu0 %v1495_v0 }
 0x1d9   :  { %1253 = vmatpush3.msra.mxu0 %v459_v17  ;;  %v748_v17 = vld [vmem:[#allocation4 + $0x158] sm:$0xff] }
 0x1da   :  { %1254 = vmatprep.subr.mxu0 %v1495_v0 }
 0x1db   :  { %1255 = vmatpush3.msra.mxu0 %v458_v18  ;;  %v747_v18 = vld [vmem:[#allocation4 + $0x150] sm:$0xff] }
 0x1dc   :  { %1256 = vmatprep.subr.mxu0 %v1495_v0 }
 0x1dd   :  { %1257 = vmatpush3.msra.mxu0 %v457_v19  ;;  %v746_v19 = vld [vmem:[#allocation4 + $0x148] sm:$0xff] }
 0x1de   :  { %1258 = vmatprep.subr.mxu0 %v1495_v0 }
 0x1df   :  { %1259 = vmatpush3.msra.mxu0 %v456_v20  ;;  %v745_v20 = vld [vmem:[#allocation4 + $0x140] sm:$0xff] }
 0x1e0   :  { %1260 = vmatprep.subr.mxu0 %v1495_v0 }
 0x1e1   :  { %1261 = vmatpush3.msra.mxu0 %v455_v21  ;;  %v744_v21 = vld [vmem:[#allocation4 + $0x138] sm:$0xff] }
 0x1e2   :  { %1262 = vmatprep.subr.mxu0 %v1495_v0 }
 0x1e3   :  { %1263 = vmatpush3.msra.mxu0 %v454_v22  ;;  %v743_v22 = vld [vmem:[#allocation4 + $0x130] sm:$0xff] }
 0x1e4   :  { %1264 = vmatprep.subr.mxu0 %v1495_v0 }
 0x1e5   :  { %1265 = vmatpush3.msra.mxu0 %v453_v23  ;;  %v742_v23 = vld [vmem:[#allocation4 + $0x128] sm:$0xff] }
 0x1e6   :  { %1266 = vmatprep.subr.mxu0 %v1495_v0 }
 0x1e7   :  { %1267 = vmatpush3.msra.mxu0 %v452_v24  ;;  %v741_v24 = vld [vmem:[#allocation4 + $0x120] sm:$0xff] }
 0x1e8   :  { %1268 = vmatprep.subr.mxu0 %v1495_v0 }
 0x1e9   :  { %1269 = vmatpush3.msra.mxu0 %v451_v25  ;;  %v740_v25 = vld [vmem:[#allocation4 + $0x118] sm:$0xff] }
 0x1ea   :  { %1270 = vmatprep.subr.mxu0 %v1495_v0 }
 0x1eb   :  { %1271 = vmatpush3.msra.mxu0 %v450_v32 }
 0x1ec   :  { %1272 = vmatprep.subr.mxu0 %v1495_v0 }
 0x1ed   :  { %1273 = vmatpush3.msra.mxu0 %v449_v33  ;;  %v739_v33 = vld [vmem:[#allocation4 + $0x110] sm:$0xff] }
 0x1ee   :  { %1274 = vmatprep.subr.mxu0 %v1495_v0 }
 0x1ef   :  { %1275 = vmatpush3.msra.mxu0 %v448_v34  ;;  %v738_v34 = vld [vmem:[#allocation4 + $0x108] sm:$0xff] }
 0x1f0   :  { %1314 = vmatprep.subr.mxu0 %v1495_v0 }
 0x290   :  { %v338_v26 = vpop.f32.mrf.mxu0 }
 0x291   :  { %v342_v28 = vadd.f32 %v338_v26, %v1580_v30  ;;  %v558_v30 = vld [vmem:[#allocation6 + $0xf0] sm:$0xff] }
 0x292   :  { %v1208_v29 = vpop.f32.mrf.mxu0 }
 0x293   :  { %v1651_v31 = vadd.f32 %v938_v27, %v342_v28  ;;  %v944_v27 = vld [vmem:[%s1759_s6 + $0x1] ss:$0 sm:$0xff] }
 0x295   :  { %1242 = vmatmul.mubr.f32.vlgmr.msra.gmra.mxu1 %v1651_v31 }
 0x296   :  { %1311 = vmatprep.mubr.msk.f32.mxu1 %vm1496_vm0, %v1495_v0  ;;  %1280 = vmatpush3.msra.mxu1 %v559_v35  ;;  %v737_v35 = vld [vmem:[#allocation4 + $0x100] sm:$0xff] }
 0x297   :  { %1281 = vmatprep.subr.mxu1 %v1495_v0 }
 0x298   :  { %1282 = vmatpush3.msra.mxu1 %v558_v30  ;;  %v848_v30 = vld [vmem:[#allocation6 + $0x178] sm:$0xff] }
 0x299   :  { %1283 = vmatprep.subr.mxu1 %v1495_v0 }
 0x29a   :  { %1284 = vmatpush3.msra.mxu1 %v557_v36  ;;  %v846_v36 = vld [vmem:[#allocation6 + $0x168] sm:$0xff] }
 0x29b   :  { %1285 = vmatprep.subr.mxu1 %v1495_v0 }
 0x29c   :  { %1286 = vmatpush3.msra.mxu1 %v556_v37  ;;  %v845_v37 = vld [vmem:[#allocation6 + $0x160] sm:$0xff] }
 0x29d   :  { %1287 = vmatprep.subr.mxu1 %v1495_v0 }
 0x29e   :  { %1288 = vmatpush3.msra.mxu1 %v555_v38  ;;  %v844_v38 = vld [vmem:[#allocation6 + $0x158] sm:$0xff] }
 0x29f   :  { %1289 = vmatprep.subr.mxu1 %v1495_v0 }
 0x2a0   :  { %1290 = vmatpush3.msra.mxu1 %v554_v39  ;;  %v843_v39 = vld [vmem:[#allocation6 + $0x150] sm:$0xff] }
 0x2a1   :  { %1291 = vmatprep.subr.mxu1 %v1495_v0 }
 0x2a2   :  { %1292 = vmatpush3.msra.mxu1 %v553_v40  ;;  %v842_v40 = vld [vmem:[#allocation6 + $0x148] sm:$0xff] }
 0x2a3   :  { %1293 = vmatprep.subr.mxu1 %v1495_v0 }
 0x2a4   :  { %1294 = vmatpush3.msra.mxu1 %v552_v41  ;;  %v841_v41 = vld [vmem:[#allocation6 + $0x140] sm:$0xff] }
 0x2a5   :  { %1295 = vmatprep.subr.mxu1 %v1495_v0 }
 0x2a6   :  { %1296 = vmatpush3.msra.mxu1 %v551_v42  ;;  %v840_v42 = vld [vmem:[#allocation6 + $0x138] sm:$0xff] }
 0x2a7   :  { %1297 = vmatprep.subr.mxu1 %v1495_v0 }
 0x2a8   :  { %1298 = vmatpush3.msra.mxu1 %v550_v43  ;;  %v839_v43 = vld [vmem:[#allocation6 + $0x130] sm:$0xff] }
 0x2a9   :  { %1299 = vmatprep.subr.mxu1 %v1495_v0 }
 0x2aa   :  { %1300 = vmatpush3.msra.mxu1 %v549_v44  ;;  %v838_v44 = vld [vmem:[#allocation6 + $0x128] sm:$0xff] }
 0x2ab   :  { %1301 = vmatprep.subr.mxu1 %v1495_v0 }
 0x2ac   :  { %1302 = vmatpush3.msra.mxu1 %v548_v45  ;;  %v837_v45 = vld [vmem:[#allocation6 + $0x120] sm:$0xff] }
 0x2ad   :  { %1303 = vmatprep.subr.mxu1 %v1495_v0 }
 0x2ae   :  { %1304 = vmatpush3.msra.mxu1 %v547_v46  ;;  %v836_v46 = vld [vmem:[#allocation6 + $0x118] sm:$0xff] }
 0x2af   :  { %1305 = vmatprep.subr.mxu1 %v1495_v0 }
 0x2b0   :  { %1306 = vmatpush3.msra.mxu1 %v546_v52  ;;  %v835_v52 = vld [vmem:[#allocation6 + $0x110] sm:$0xff] }
 0x2b1   :  { %1307 = vmatprep.subr.mxu1 %v1495_v0 }
 0x2b2   :  { %1308 = vmatpush3.msra.mxu1 %v545_v53  ;;  %v834_v53 = vld [vmem:[#allocation6 + $0x108] sm:$0xff] }
 0x2b3   :  { %1309 = vmatprep.subr.mxu1 %v1495_v0 }
 0x2b4   :  { %1310 = vmatpush3.msra.mxu1 %v544_v54  ;;  %v833_v54 = vld [vmem:[#allocation6 + $0x100] sm:$0xff] }
 0x2b5   :  { %1349 = vmatprep.subr.mxu1 %v1495_v0 }
 0x355   :  { %v442_v48 = vpop.f32.mrf.mxu1 }
 0x356   :  { %v443_v49 = vadd.f32 %v940_v47, %v442_v48  ;;  %v946_v47 = vld [vmem:[%s1755_s2 + $0x2] ss:$0 sm:$0xff] }
 0x357   :  { %v1243_v50 = vpop.f32.mrf.mxu1 }
 0x358   :  { %v446_v51 = vmax.f32 %v443_v49, 0.0 }
 0x35a   :  { %1277 = vmatmul.mubr.f32.vlgmr.msra.gmra.mxu0 %v446_v51 }
 0x35b   :  { %1346 = vmatprep.mubr.msk.f32.mxu0 %vm1496_vm0, %v1495_v0  ;;  %1315 = vmatpush3.msra.mxu0 %v656_v55  ;;  %v948_v55 = vld [vmem:[%s1757_s4 + $0x2] ss:$0 sm:$0xff] }
 0x35c   :  { %1316 = vmatprep.subr.mxu0 %v1495_v0 }
 0x35d   :  { %1317 = vmatpush3.msra.mxu0 %v655_v56 }
 0x35e   :  { %1318 = vmatprep.subr.mxu0 %v1495_v0 }
 0x35f   :  { %1319 = vmatpush3.msra.mxu0 %v654_v57 }
 0x360   :  { %1320 = vmatprep.subr.mxu0 %v1495_v0 }
 0x361   :  { %1321 = vmatpush3.msra.mxu0 %v653_v58 }
 0x362   :  { %1322 = vmatprep.subr.mxu0 %v1495_v0 }
 0x363   :  { %1323 = vmatpush3.msra.mxu0 %v652_v59 }
 0x364   :  { %1324 = vmatprep.subr.mxu0 %v1495_v0 }
 0x365   :  { %1325 = vmatpush3.msra.mxu0 %v651_v60 }
 0x366   :  { %1326 = vmatprep.subr.mxu0 %v1495_v0 }
 0x367   :  { %1327 = vmatpush3.msra.mxu0 %v650_v61  ;;  %v950_v61 = vld [vmem:[%s1759_s6 + $0x2] ss:$0 sm:$0xff] }
 0x368   :  { %1328 = vmatprep.subr.mxu0 %v1495_v0 }
 0x369   :  { %1329 = vmatpush3.msra.mxu0 %v649_v62 }
 0x36a   :  { %1330 = vmatprep.subr.mxu0 %v1495_v0 }
 0x36b   :  { %1331 = vmatpush3.msra.mxu0 %v648_v63 }
 0x36c   :  { %1332 = vmatprep.subr.mxu0 %v1495_v0 }
 0x36d   :  { %1333 = vmatpush3.msra.mxu0 %v647_v1 }
 0x36e   :  { %1334 = vmatprep.subr.mxu0 %v1495_v0 }
 0x36f   :  { %1335 = vmatpush3.msra.mxu0 %v646_v2 }
 0x370   :  { %1336 = vmatprep.subr.mxu0 %v1495_v0 }
 0x371   :  { %1337 = vmatpush3.msra.mxu0 %v645_v3 }
 0x372   :  { %1338 = vmatprep.subr.mxu0 %v1495_v0 }
 0x373   :  { %1339 = vmatpush3.msra.mxu0 %v644_v4 }
 0x374   :  { %1340 = vmatprep.subr.mxu0 %v1495_v0 }
 0x375   :  { %1341 = vmatpush3.msra.mxu0 %v643_v10 }
 0x376   :  { %1342 = vmatprep.subr.mxu0 %v1495_v0 }
 0x377   :  { %1343 = vmatpush3.msra.mxu0 %v642_v11 }
 0x378   :  { %1344 = vmatprep.subr.mxu0 %v1495_v0 }
 0x379   :  { %1345 = vmatpush3.msra.mxu0 %v641_v12 }
 0x37a   :  { %1384 = vmatprep.subr.mxu0 %v1495_v0 }
 0x41a   :  { %v538_v6 = vpop.f32.mrf.mxu0 }
 0x41b   :  { %v539_v7 = vadd.f32 %v942_v5, %v538_v6 }
 0x41c   :  { %v1278_v8 = vpop.f32.mrf.mxu0 }
 0x41d   :  { %v542_v9 = vmax.f32 %v539_v7, 0.0 }
 0x41f   :  { %1312 = vmatmul.mubr.f32.vlgmr.msra.gmra.mxu1 %v542_v9 }
 0x420   :  { %1381 = vmatprep.mubr.msk.f32.mxu1 %vm1496_vm0, %v1495_v0  ;;  %1350 = vmatpush3.msra.mxu1 %v752_v13 }
 0x421   :  { %1351 = vmatprep.subr.mxu1 %v1495_v0 }
 0x422   :  { %1352 = vmatpush3.msra.mxu1 %v751_v14 }
 0x423   :  { %1353 = vmatprep.subr.mxu1 %v1495_v0 }
 0x424   :  { %1354 = vmatpush3.msra.mxu1 %v750_v15 }
 0x425   :  { %1355 = vmatprep.subr.mxu1 %v1495_v0 }
 0x426   :  { %1356 = vmatpush3.msra.mxu1 %v749_v16 }
 0x427   :  { %1357 = vmatprep.subr.mxu1 %v1495_v0 }
 0x428   :  { %1358 = vmatpush3.msra.mxu1 %v748_v17 }
 0x429   :  { %1359 = vmatprep.subr.mxu1 %v1495_v0 }
 0x42a   :  { %1360 = vmatpush3.msra.mxu1 %v747_v18 }
 0x42b   :  { %1361 = vmatprep.subr.mxu1 %v1495_v0 }
 0x42c   :  { %1362 = vmatpush3.msra.mxu1 %v746_v19 }
 0x42d   :  { %1363 = vmatprep.subr.mxu1 %v1495_v0 }
 0x42e   :  { %1364 = vmatpush3.msra.mxu1 %v745_v20 }
 0x42f   :  { %1365 = vmatprep.subr.mxu1 %v1495_v0 }
 0x430   :  { %1366 = vmatpush3.msra.mxu1 %v744_v21 }
 0x431   :  { %1367 = vmatprep.subr.mxu1 %v1495_v0 }
 0x432   :  { %1368 = vmatpush3.msra.mxu1 %v743_v22 }
 0x433   :  { %1369 = vmatprep.subr.mxu1 %v1495_v0 }
 0x434   :  { %1370 = vmatpush3.msra.mxu1 %v742_v23 }
 0x435   :  { %1371 = vmatprep.subr.mxu1 %v1495_v0 }
 0x436   :  { %1372 = vmatpush3.msra.mxu1 %v741_v24 }
 0x437   :  { %1373 = vmatprep.subr.mxu1 %v1495_v0 }
 0x438   :  { %1374 = vmatpush3.msra.mxu1 %v740_v25 }
 0x439   :  { %1375 = vmatprep.subr.mxu1 %v1495_v0 }
 0x43a   :  { %1376 = vmatpush3.msra.mxu1 %v739_v33 }
 0x43b   :  { %1377 = vmatprep.subr.mxu1 %v1495_v0 }
 0x43c   :  { %1378 = vmatpush3.msra.mxu1 %v738_v34 }
 0x43d   :  { %1379 = vmatprep.subr.mxu1 %v1495_v0 }
 0x43e   :  { %1380 = vmatpush3.msra.mxu1 %v737_v35 }
 0x4df   :  { %v626_v26 = vpop.f32.mrf.mxu1 }
 0x4e0   :  { %v630_v28 = vadd.f32 %v626_v26, %v1651_v31  ;;  %v847_v31 = vld [vmem:[#allocation6 + $0x170] sm:$0xff] }
 0x4e1   :  { %v1313_v29 = vpop.f32.mrf.mxu1 }
 0x4e2   :  { %v1718_v32 = vadd.f32 %v944_v27, %v630_v28 }
 0x4e4   :  { %1347 = vmatmul.mubr.f32.vlgmr.msra.gmra.mxu0 %v1718_v32 }
 0x4e5   :  { %1416 = vmatprep.mubr.msk.f32.mxu0 %vm1496_vm0, %v1495_v0  ;;  %1385 = vmatpush3.msra.mxu0 %v848_v30 }
 0x4e6   :  { %1386 = vmatprep.subr.mxu0 %v1495_v0 }
 0x4e7   :  { %1387 = vmatpush3.msra.mxu0 %v847_v31 }
 0x4e8   :  { %1388 = vmatprep.subr.mxu0 %v1495_v0 }
 0x4e9   :  { %1389 = vmatpush3.msra.mxu0 %v846_v36 }
 0x4ea   :  { %1390 = vmatprep.subr.mxu0 %v1495_v0 }
 0x4eb   :  { %1391 = vmatpush3.msra.mxu0 %v845_v37 }
 0x4ec   :  { %1392 = vmatprep.subr.mxu0 %v1495_v0 }
 0x4ed   :  { %1393 = vmatpush3.msra.mxu0 %v844_v38 }
 0x4ee   :  { %1394 = vmatprep.subr.mxu0 %v1495_v0 }
 0x4ef   :  { %1395 = vmatpush3.msra.mxu0 %v843_v39 }
 0x4f0   :  { %1396 = vmatprep.subr.mxu0 %v1495_v0 }
 0x4f1   :  { %1397 = vmatpush3.msra.mxu0 %v842_v40 }
 0x4f2   :  { %1398 = vmatprep.subr.mxu0 %v1495_v0 }
 0x4f3   :  { %1399 = vmatpush3.msra.mxu0 %v841_v41 }
 0x4f4   :  { %1400 = vmatprep.subr.mxu0 %v1495_v0 }
 0x4f5   :  { %1401 = vmatpush3.msra.mxu0 %v840_v42 }
 0x4f6   :  { %1402 = vmatprep.subr.mxu0 %v1495_v0 }
 0x4f7   :  { %1403 = vmatpush3.msra.mxu0 %v839_v43 }
 0x4f8   :  { %1404 = vmatprep.subr.mxu0 %v1495_v0 }
 0x4f9   :  { %1405 = vmatpush3.msra.mxu0 %v838_v44 }
 0x4fa   :  { %1406 = vmatprep.subr.mxu0 %v1495_v0 }
 0x4fb   :  { %1407 = vmatpush3.msra.mxu0 %v837_v45 }
 0x4fc   :  { %1408 = vmatprep.subr.mxu0 %v1495_v0 }
 0x4fd   :  { %1409 = vmatpush3.msra.mxu0 %v836_v46 }
 0x4fe   :  { %1410 = vmatprep.subr.mxu0 %v1495_v0 }
 0x4ff   :  { %1411 = vmatpush3.msra.mxu0 %v835_v52 }
 0x500   :  { %1412 = vmatprep.subr.mxu0 %v1495_v0 }
 0x501   :  { %1413 = vmatpush3.msra.mxu0 %v834_v53 }
 0x502   :  { %1414 = vmatprep.subr.mxu0 %v1495_v0 }
 0x503   :  { %1415 = vmatpush3.msra.mxu0 %v833_v54 }
 0x5a4   :  { %v731_v48 = vpop.f32.mrf.mxu0 }
 0x5a5   :  { %v732_v49 = vadd.f32 %v946_v47, %v731_v48 }
 0x5a6   :  { %v1348_v50 = vpop.f32.mrf.mxu0 }
 0x5a7   :  { %v735_v51 = vmax.f32 %v732_v49, 0.0 }
 0x5a9   :  { %1382 = vmatmul.mubr.f32.vlgmr.msra.gmra.mxu1 %v735_v51 }
 0x669   :  { %v827_v56 = vpop.f32.mrf.mxu1 }
 0x66a   :  { %v828_v57 = vadd.f32 %v948_v55, %v827_v56 }
 0x66b   :  { %v1383_v58 = vpop.f32.mrf.mxu1 }
 0x66c   :  { %v831_v59 = vmax.f32 %v828_v57, 0.0 }
 0x66e   :  { %1417 = vmatmul.mubr.f32.vlgmr.msra.gmra.mxu0 %v831_v59 }
 0x72e   :  { %v915_v60 = vpop.f32.mrf.mxu0 }
 0x72f   :  { %v919_v62 = vadd.f32 %v915_v60, %v1718_v32 }
 0x730   :  { %v1418_v63 = vpop.f32.mrf.mxu0 }
 0x731   :  { %v928_v0 = vadd.f32 %v950_v61, %v919_v62 }
 0x733   :  { %929 = vst [vmem:[%s1760_s7] sm:$0xff] %v928_v0 }
 0x734   :  { %934 = vsyncpa [#allocation3], 1 }
 0x735   :  { %935 = vsyncpa [#allocation5], 1 }

</bundles_post_ra>
